<compile_context>
chip_gen: v5e
topology: v5e:2x2
jax: 0.10.0
libtpu: 0.0.40
codegen_flags: <defaults>
</compile_context>

<pallas_src>
import jax
import jax.numpy as jnp
from jax.experimental import pallas as pl
from jax.experimental.pallas import tpu as pltpu


def _fused_masked_mlp_kernel(x_ref, w1_ref, b1_ref, w2_ref, b2_ref, o_ref):
    """One batch tile: o = relu(x @ W1_eff + b1) @ W2_eff + b2.

    W*_eff are the pre-folded (weight * pruning_mask), pre-transposed to
    [Din, Dout], stored bf16.  Matmuls accumulate in f32 on the MXU; bias add
    and ReLU run in f32 on the VPU.  The hidden activation never touches VMEM
    scratch or HBM — it is a live value between the two dots.
    """
    # ---- layer 1: h = relu(x @ W1_eff + b1) ----
    h = jax.lax.dot_general(
        x_ref[...].astype(jnp.bfloat16), w1_ref[...],
        dimension_numbers=(((1,), (0,)), ((), ())),
        preferred_element_type=jnp.float32,
    )
    h_act = jnp.maximum(h + b1_ref[...], 0.0).astype(jnp.bfloat16)

    # ---- layer 2: y = h @ W2_eff + b2 ----
    y = jax.lax.dot_general(
        h_act, w2_ref[...],
        dimension_numbers=(((1,), (0,)), ((), ())),
        preferred_element_type=jnp.float32,
    )
    o_ref[...] = (y + b2_ref[...]).astype(o_ref.dtype)


def fused_masked_mlp(x, layer1, layer2, *, batch_tile=None):
    """Single pallas_call for the whole masked-MLP forward.

    x:       [B, Din] f32 (flattened input)
    layer*:  dict with "weight_eff_t" [Din, Dout] bf16 (mask pre-folded,
             pre-transposed) and "bias2d" [1, Dout] f32.
    batch_tile: rows per grid step.  Default: whole batch if B <= 128, else
             128 (full v5e MXU height; pass 256 on v6e/v7x for peak TF/s).
    """
    B, Din = x.shape
    Dh = layer1["weight_eff_t"].shape[1]
    Dout = layer2["weight_eff_t"].shape[1]

    if batch_tile is None:
        batch_tile = B if B <= 128 else 128
    assert B % batch_tile == 0, (B, batch_tile)

    grid = (B // batch_tile,)
    return pl.pallas_call(
        _fused_masked_mlp_kernel,
        out_shape=jax.ShapeDtypeStruct((B, Dout), x.dtype),
        grid_spec=pl.GridSpec(
            grid=grid,
            in_specs=[
                # batch tile of the input streams per grid step
                pl.BlockSpec((batch_tile, Din), lambda i: (i, 0)),
                # effective weights / biases: same block every step -> resident
                # (on v7x, add pipeline_mode=pl.Buffered(1) to single-buffer)
                pl.BlockSpec((Din, Dh), lambda i: (0, 0)),
                pl.BlockSpec((1, Dh), lambda i: (0, 0)),
                pl.BlockSpec((Dh, Dout), lambda i: (0, 0)),
                pl.BlockSpec((1, Dout), lambda i: (0, 0)),
            ],
            out_specs=pl.BlockSpec((batch_tile, Dout), lambda i: (i, 0)),
        ),
        compiler_params=pltpu.CompilerParams(
            # batch axis is independent -> shardable across v7x's 2 TensorCores
            dimension_semantics=("parallel",),
        ),
    )(x, layer1["weight_eff_t"], layer1["bias2d"],
      layer2["weight_eff_t"], layer2["bias2d"])


# ---------------------------------------------------------------------------
# Deterministic parameter construction (mirrors BaseModel.initialize()):
#   - weights: Xavier normal  (std = sqrt(2 / (fan_in + fan_out)))
#   - biases:  PyTorch Linear default uniform(-1/sqrt(fan_in), 1/sqrt(fan_in))
#   - pruning_mask: all ones, uint8
# The mask is folded into the weight HERE (once per pruning round, not per
# forward step) and the result is transposed to the MXU-native [Din, Dout]
# layout and stored bf16 — the kernel never sees the raw mask.
# ---------------------------------------------------------------------------
def make_fc_layer(key, fan_in, fan_out):
    kw, kb = jax.random.split(key)
    std = (2.0 / (fan_in + fan_out)) ** 0.5
    weight = std * jax.random.normal(kw, (fan_out, fan_in), dtype=jnp.float32)
    bound = 1.0 / (fan_in ** 0.5)
    bias = jax.random.uniform(kb, (fan_out,), dtype=jnp.float32,
                              minval=-bound, maxval=bound)
    pruning_mask = jnp.ones((fan_out, fan_in), dtype=jnp.uint8)

    # effective weight = weight * mask, folded once, transposed once, bf16.
    weight_eff_t = (weight * pruning_mask.astype(jnp.float32)).T.astype(jnp.bfloat16)
    return {
        # raw per-layer state kept for LTH bookkeeping (reset / re-prune):
        "weight": weight,
        "bias": bias,
        "pruning_mask": pruning_mask,
        "initial_weights": weight,
        "initial_biases": bias,
        # kernel-facing tensors:
        "weight_eff_t": weight_eff_t,          # [Din, Dout] bf16
        "bias2d": bias.reshape(1, fan_out),    # [1, Dout]   f32
    }


def model_forward(x_img, layer1, layer2, *, batch_tile=None):
    """Concrete LTH-style forward: flatten -> fc1 -> ReLU -> fc2 (one kernel)."""
    x = x_img.reshape(x_img.shape[0], -1)
    return fused_masked_mlp(x, layer1, layer2, batch_tile=batch_tile)


if __name__ == "__main__":
    key = jax.random.PRNGKey(0)
    k_in, k_l1, k_l2 = jax.random.split(key, 3)

    # 128-aligned shapes: batch fills one full MXU-height tile (single grid
    # step), flattened 1x16x16 image -> 256 features.
    batch, C, H, W = 128, 1, 16, 16
    d_in = C * H * W          # 256
    d_hidden, d_out = 256, 128

    x_img = jax.random.normal(k_in, (batch, C, H, W), dtype=jnp.float32)
    layer1 = make_fc_layer(k_l1, d_in, d_hidden)
    layer2 = make_fc_layer(k_l2, d_in=d_hidden, d_out=d_out) if False else make_fc_layer(k_l2, d_hidden, d_out)

    y = model_forward(x_img, layer1, layer2)
    jax.block_until_ready(y)

    # Pure-JAX reference with identical bf16-input / f32-accumulate math.
    def ref_forward(x_img, l1, l2):
        x = x_img.reshape(x_img.shape[0], -1)
        h = jnp.dot(x.astype(jnp.bfloat16), l1["weight_eff_t"],
                    preferred_element_type=jnp.float32)
        h = jnp.maximum(h + l1["bias2d"], 0.0).astype(jnp.bfloat16)
        out = jnp.dot(h, l2["weight_eff_t"],
                      preferred_element_type=jnp.float32)
        return out + l2["bias2d"]

    y_ref = ref_forward(x_img, layer1, layer2)
    assert y.shape == (batch, d_out)
    assert jnp.allclose(y, y_ref, atol=2e-3, rtol=2e-3), (
        float(jnp.max(jnp.abs(y - y_ref))))

    print("KERNEL_OK")
</pallas_src>

<mosaic_0001>
module attributes {stable_mosaic.version = 11 : i64} {
  func.func @_fused_masked_mlp_kernel(%arg0: i32, %arg1: memref<128x256xf32, #tpu.memory_space<vmem>>, %arg2: memref<256x256xbf16, #tpu.memory_space<vmem>>, %arg3: memref<1x256xf32, #tpu.memory_space<vmem>>, %arg4: memref<256x128xbf16, #tpu.memory_space<vmem>>, %arg5: memref<1x128xf32, #tpu.memory_space<vmem>>, %arg6: memref<128x128xf32, #tpu.memory_space<vmem>>) attributes {dimension_semantics = [#tpu.dimension_semantics<parallel>], iteration_bounds = array<i64: 1>, scalar_prefetch = 0 : i64, scratch_operands = 0 : i64, tpu.core_type = #tpu.core_type<tc>, window_params = [{transform_indices = @transform_0, window_bounds = array<i64: 128, 256>}, {pipeline_mode = #tpu.pipeline_mode<synchronous>, transform_indices = @transform_1, window_bounds = array<i64: 256, 256>}, {pipeline_mode = #tpu.pipeline_mode<synchronous>, transform_indices = @transform_2, window_bounds = array<i64: 1, 256>}, {pipeline_mode = #tpu.pipeline_mode<synchronous>, transform_indices = @transform_3, window_bounds = array<i64: 256, 128>}, {pipeline_mode = #tpu.pipeline_mode<synchronous>, transform_indices = @transform_4, window_bounds = array<i64: 1, 128>}, {transform_indices = @transform_5, window_bounds = array<i64: 128, 128>}]} {
    %c0 = arith.constant 0 : index
    %c0_0 = arith.constant 0 : index
    %0 = vector.load %arg1[%c0, %c0_0] : memref<128x256xf32, #tpu.memory_space<vmem>>, vector<128x256xf32>
    %1 = arith.truncf %0 : vector<128x256xf32> to vector<128x256xbf16>
    %c0_1 = arith.constant 0 : index
    %c0_2 = arith.constant 0 : index
    %2 = vector.load %arg2[%c0_1, %c0_2] : memref<256x256xbf16, #tpu.memory_space<vmem>>, vector<256x256xbf16>
    %cst = arith.constant dense<0.000000e+00> : vector<128x256xf32>
    %3 = tpu.matmul %1, %2, %cst {dimension_numbers = #tpu.dot_dimension_numbers<[1], [0], [0], [1], [0, 0, 1, 1], [], []>} : vector<128x256xbf16>, vector<256x256xbf16>, vector<128x256xf32> -> vector<128x256xf32>
    %c0_3 = arith.constant 0 : index
    %c0_4 = arith.constant 0 : index
    %4 = vector.load %arg3[%c0_3, %c0_4] : memref<1x256xf32, #tpu.memory_space<vmem>>, vector<1x256xf32>
    %5 = vector.broadcast %4 : vector<1x256xf32> to vector<128x256xf32>
    %6 = arith.addf %3, %5 : vector<128x256xf32>
    %cst_5 = arith.constant 0.000000e+00 : f32
    %7 = vector.broadcast %cst_5 : f32 to vector<128x256xf32>
    %8 = arith.maximumf %6, %7 : vector<128x256xf32>
    %9 = arith.truncf %8 : vector<128x256xf32> to vector<128x256xbf16>
    %c0_6 = arith.constant 0 : index
    %c0_7 = arith.constant 0 : index
    %10 = vector.load %arg4[%c0_6, %c0_7] : memref<256x128xbf16, #tpu.memory_space<vmem>>, vector<256x128xbf16>
    %cst_8 = arith.constant dense<0.000000e+00> : vector<128x128xf32>
    %11 = tpu.matmul %9, %10, %cst_8 {dimension_numbers = #tpu.dot_dimension_numbers<[1], [0], [0], [1], [0, 0, 1, 1], [], []>} : vector<128x256xbf16>, vector<256x128xbf16>, vector<128x128xf32> -> vector<128x128xf32>
    %c0_9 = arith.constant 0 : index
    %c0_10 = arith.constant 0 : index
    %12 = vector.load %arg5[%c0_9, %c0_10] : memref<1x128xf32, #tpu.memory_space<vmem>>, vector<1x128xf32>
    %13 = vector.broadcast %12 : vector<1x128xf32> to vector<128x128xf32>
    %14 = arith.addf %11, %13 : vector<128x128xf32>
    %c0_11 = arith.constant 0 : index
    %c0_12 = arith.constant 0 : index
    %15 = vector.load %arg6[%c0_11, %c0_12] : memref<128x128xf32, #tpu.memory_space<vmem>>, vector<128x128xf32>
    tpu.vector_store %arg6[%c0_11, %c0_12], %14 {strides = array<i32>} : memref<128x128xf32, #tpu.memory_space<vmem>>, vector<128x128xf32>,
    return
  }
  func.func @transform_0(%arg0: i32) -> (i32, i32) {
    %c0_i32 = arith.constant 0 : i32
    %c0_i32_0 = arith.constant 0 : i32
    return %arg0, %c0_i32 : i32, i32
  }
  func.func @transform_1(%arg0: i32) -> (i32, i32) {
    %c0_i32 = arith.constant 0 : i32
    %c0_i32_0 = arith.constant 0 : i32
    %c0_i32_1 = arith.constant 0 : i32
    return %c0_i32, %c0_i32_0 : i32, i32
  }
  func.func @transform_2(%arg0: i32) -> (i32, i32) {
    %c0_i32 = arith.constant 0 : i32
    %c0_i32_0 = arith.constant 0 : i32
    %c0_i32_1 = arith.constant 0 : i32
    return %c0_i32, %c0_i32_0 : i32, i32
  }
  func.func @transform_3(%arg0: i32) -> (i32, i32) {
    %c0_i32 = arith.constant 0 : i32
    %c0_i32_0 = arith.constant 0 : i32
    %c0_i32_1 = arith.constant 0 : i32
    return %c0_i32, %c0_i32_0 : i32, i32
  }
  func.func @transform_4(%arg0: i32) -> (i32, i32) {
    %c0_i32 = arith.constant 0 : i32
    %c0_i32_0 = arith.constant 0 : i32
    %c0_i32_1 = arith.constant 0 : i32
    return %c0_i32, %c0_i32_0 : i32, i32
  }
  func.func @transform_5(%arg0: i32) -> (i32, i32) {
    %c0_i32 = arith.constant 0 : i32
    %c0_i32_0 = arith.constant 0 : i32
    return %arg0, %c0_i32 : i32, i32
  }
}

</mosaic_0001>

<bundles_post_ra>
// kernel: tpu_custom_call.1
= control target key start
LH: loop header
LB: loop body
LE: loop exit
PB: predicated region body
PF: predicated region fallthrough
CT: control target
= control target key end

     0   :  { %10 = vsyncpa [#allocation3], 0  ;;  %s1412_s0 = inlined_call_operand.hbm [shape: f32[128,256], index: 0, kind: input, shape index: {}]   ;;  %s1413_s1 = inlined_call_operand.hbm [shape: bf16[256,256], index: 1, kind: input, shape index: {}]   ;;  %s1414_s2 = inlined_call_operand.hbm [shape: f32[1,256], index: 2, kind: input, shape index: {}]   ;;  %s1415_s3 = inlined_call_operand.hbm [shape: bf16[256,128], index: 3, kind: input, shape index: {}]   ;;  %s1416_s4 = inlined_call_operand.vmem [shape: f32[1,128], index: 4, kind: input, shape index: {}]   ;;  %s1417_s5 = inlined_call_operand.hbm [shape: f32[128,128], index: 5, kind: output, shape index: {}]  }
   0x1   :  { %11 = vsyncpa [#allocation6], 0 }
   0x2   :  { %12 = vsyncpa [#allocation9], 0  ;;  %s31_s20 = sshll.u32 %s1413_s1, 4  ;;  %s32_s20 = int_to_ptr.hbm [resolvable:$true] %s31_s20 }
   0x3   :  { %13 = vsyncpa [#allocation4], 0  ;;  %s1235_s21 = smov [#allocation5]   ;;  %s18_s25 = sshll.u32 %s1412_s0, 4  ;;  %s19_s25 = int_to_ptr.hbm [resolvable:$true] %s18_s25 }
   0x4   :  { %s33_s22 = sshll.u32 %s1235_s21, 4  ;;  %s1236_s26 = smov 128   ;;  %s34_s22 = int_to_ptr.vmem [resolvable:$true] %s33_s22 }
   0x5   :  { %s1237_s27 = smov 8   ;;  %s1238_s28 = smov [#allocation2]  }
   0x6   :  { %39 = dma.hbm_to_vmem [thread:$0]  %s32_s20, 4096, %s34_s22, [#allocation6], %s1236_s26, %s1236_s26, %s1237_s27  }
   0x7   :  { %s20_s29 = sshll.u32 %s1238_s28, 4  ;;  %s1239_s1 = smov 256   ;;  %s21_s29 = int_to_ptr.vmem [resolvable:$true] %s20_s29 }
   0x8   :  { %s1240_s30 = smov 16   ;;  %s45_s8 = sshll.u32 %s1414_s2, 4  ;;  %s46_s8 = int_to_ptr.hbm [resolvable:$true] %s45_s8 }
   0x9   :  { %26 = dma.hbm_to_vmem [thread:$0]  %s19_s25, 4096, %s21_s29, [#allocation3], %s1239_s1, %s1239_s1, %s1240_s30  }
   0xa   :  { %s1241_s9 = smov [#allocation7]   ;;  %s55_s12 = sshll.u32 %s1415_s3, 4  ;;  %s56_s12 = int_to_ptr.hbm [resolvable:$true] %s55_s12 }
   0xb   :  { %s47_s0 = sshll.u32 %s1241_s9, 4  ;;  %s1242_s13 = smov [#allocation8]   ;;  %s48_s0 = int_to_ptr.vmem [resolvable:$true] %s47_s0 }
   0xc   :  { %50 = dma.hbm_to_vmem [thread:$0]  %s46_s8, 32, %s48_s0, [#allocation6]  }
   0xd   :  { %s57_s14 = sshll.u32 %s1242_s13, 4  ;;  %s1243_s15 = smov 64   ;;  %s58_s14 = int_to_ptr.vmem [resolvable:$true] %s57_s14 }
   0xe   :  { %s1244_s16 = smov 4  }
   0xf   :  { %63 = dma.hbm_to_vmem [thread:$0]  %s56_s12, 2048, %s58_s14, [#allocation9], %s1243_s15, %s1243_s15, %s1244_s16  }
  0x10   :  { %1227 = dma.done.wait [#allocation3], 4096  }
  0x11   :  { %1228 = vsyncadd [#allocation3], 4294963200 }
  0x12   :  { %1229 = dma.done.wait [#allocation6], 4128  }
  0x13   :  { %1230 = vsyncadd [#allocation6], 4294963168 }
  0x14   :  { %1231 = dma.done.wait [#allocation9], 2048  }
  0x15   :  { %1232 = vsyncadd [#allocation9], 4294965248  ;;  %v897_v0 = vld [vmem:[#allocation5 + $0x70] sm:$0xf]  ;;  %v1046_v1 = vld [vmem:[#allocation5 + $0x74] sm:$0xf0] }
  0x16   :  { %v961_v2 = vld [vmem:[#allocation5 + $0xf0] sm:$0xf]  ;;  %v898_v3 = vor.u32 %v1046_v1, %v897_v0  ;;  %v1062_v4 = vld [vmem:[#allocation5 + $0xf4] sm:$0xf0]  ;;  %v889_v5 = vld [vmem:[#allocation5 + $0x60] sm:$0xf] }
  0x17   :  { %v1044_v6 = vld [vmem:[#allocation5 + $0x64] sm:$0xf0]  ;;  %v962_v7 = vor.u32 %v1062_v4, %v961_v2  ;;  %v953_v8 = vld [vmem:[#allocation5 + $0xe0] sm:$0xf]  ;;  %v881_v12 = vld [vmem:[#allocation5 + $0x50] sm:$0xf] }
  0x18   :  { %v1060_v9 = vld [vmem:[#allocation5 + $0xe4] sm:$0xf0]  ;;  %328 = vmatpush.bf16.msra.mxu0 %v898_v3  ;;  %1079 = vmatpush.bf16.msra.mxu2 %v898_v3  ;;  %v890_v10 = vor.u32 %v1044_v6, %v889_v5  ;;  %v1042_v13 = vld [vmem:[#allocation5 + $0x54] sm:$0xf0]  ;;  %v945_v14 = vld [vmem:[#allocation5 + $0xd0] sm:$0xf] }
  0x19   :  { %1087 = vmatpush.bf16.msra.mxu3 %v962_v7  ;;  %377 = vmatpush.bf16.msra.mxu1 %v962_v7  ;;  %v954_v11 = vor.u32 %v1060_v9, %v953_v8  ;;  %v1058_v15 = vld [vmem:[#allocation5 + $0xd4] sm:$0xf0]  ;;  %v882_v16 = vor.u32 %v1042_v13, %v881_v12  ;;  %v873_v18 = vld [vmem:[#allocation5 + $0x40] sm:$0xf]  ;;  %v1040_v19 = vld [vmem:[#allocation5 + $0x44] sm:$0xf0] }
  0x1a   :  { %v946_v17 = vor.u32 %v1058_v15, %v945_v14  ;;  %v937_v20 = vld [vmem:[#allocation5 + $0xc0] sm:$0xf]  ;;  %v1056_v21 = vld [vmem:[#allocation5 + $0xc4] sm:$0xf0]  ;;  %v874_v22 = vor.u32 %v1040_v19, %v873_v18  ;;  %v865_v24 = vld [vmem:[#allocation5 + $0x30] sm:$0xf] }
  0x1b   :  { %v938_v23 = vor.u32 %v1056_v21, %v937_v20  ;;  %v1038_v25 = vld [vmem:[#allocation5 + $0x34] sm:$0xf0]  ;;  %v929_v26 = vld [vmem:[#allocation5 + $0xb0] sm:$0xf]  ;;  %v857_v30 = vld [vmem:[#allocation5 + $0x20] sm:$0xf] }
  0x1c   :  { %329 = vmatpush.bf16.msra.mxu0 %v890_v10  ;;  %1080 = vmatpush.bf16.msra.mxu2 %v890_v10  ;;  %v1054_v27 = vld [vmem:[#allocation5 + $0xb4] sm:$0xf0]  ;;  %v866_v28 = vor.u32 %v1038_v25, %v865_v24  ;;  %v1036_v31 = vld [vmem:[#allocation5 + $0x24] sm:$0xf0]  ;;  %v921_v32 = vld [vmem:[#allocation5 + $0xa0] sm:$0xf] }
  0x1d   :  { %1088 = vmatpush.bf16.msra.mxu3 %v954_v11  ;;  %378 = vmatpush.bf16.msra.mxu1 %v954_v11  ;;  %v930_v29 = vor.u32 %v1054_v27, %v929_v26  ;;  %v1052_v33 = vld [vmem:[#allocation5 + $0xa4] sm:$0xf0]  ;;  %v858_v34 = vor.u32 %v1036_v31, %v857_v30  ;;  %v849_v36 = vld [vmem:[#allocation5 + $0x10] sm:$0xf]  ;;  %v1034_v37 = vld [vmem:[#allocation5 + $0x14] sm:$0xf0] }
  0x1e   :  { %v922_v35 = vor.u32 %v1052_v33, %v921_v32  ;;  %v913_v38 = vld [vmem:[#allocation5 + $0x90] sm:$0xf]  ;;  %v1050_v39 = vld [vmem:[#allocation5 + $0x94] sm:$0xf0]  ;;  %v850_v40 = vor.u32 %v1034_v37, %v849_v36  ;;  %v841_v41 = vld [vmem:[#allocation5] sm:$0xf] }
  0x1f   :  { %v914_v42 = vor.u32 %v1050_v39, %v913_v38  ;;  %v1032_v43 = vld [vmem:[#allocation5 + $0x4] sm:$0xf0]  ;;  %v905_v44 = vld [vmem:[#allocation5 + $0x80] sm:$0xf]  ;;  %v84_v47 = vld [vmem:[#allocation2 + $0x10] sm:$0xff]  ;;  %s824_s20 = sshll.u32 %s1417_s5, 4  ;;  %s825_s20 = int_to_ptr.hbm [resolvable:$true] %s824_s20 }
  0x20   :  { %330 = vmatpush.bf16.msra.mxu0 %v882_v16  ;;  %1081 = vmatpush.bf16.msra.mxu2 %v882_v16  ;;  %v1048_v45 = vld [vmem:[#allocation5 + $0x84] sm:$0xf0]  ;;  %v82_v46 = vld [vmem:[#allocation2] sm:$0xff]  ;;  %v1045_v48 = vld [vmem:[#allocation5 + $0x74] sm:$0xf]  ;;  %v842_v52 = vor.u32 %v1032_v43, %v841_v41 }
  0x21   :  { %1089 = vmatpush.bf16.msra.mxu3 %v946_v17  ;;  %379 = vmatpush.bf16.msra.mxu1 %v946_v17  ;;  %v899_v49 = vld [vmem:[#allocation5 + $0x78] sm:$0xf0]  ;;  %v1061_v50 = vld [vmem:[#allocation5 + $0xf4] sm:$0xf]  ;;  %v98_v53 = vld [vmem:[#allocation2 + $0x80] sm:$0xff]  ;;  %v906_v56 = vor.u32 %v1048_v45, %v905_v44  ;;  %v1291_v63 = vpack.c.bf16 %v84_v47, %v82_v46 }
  0x22   :  { %v963_v51 = vld [vmem:[#allocation5 + $0xf8] sm:$0xf0]  ;;  %v100_v54 = vld [vmem:[#allocation2 + $0x90] sm:$0xff]  ;;  %v99_v55 = vld [vmem:[#allocation2 + $0x88] sm:$0xff]  ;;  %v902_v60 = vor.u32 %v1045_v48, %v899_v49 }
  0x23   :  { %v101_v57 = vld [vmem:[#allocation2 + $0x98] sm:$0xff]  ;;  %v83_v58 = vld [vmem:[#allocation2 + $0x8] sm:$0xff]  ;;  %v966_v61 = vor.u32 %v1061_v50, %v963_v51  ;;  %v1043_v62 = vld [vmem:[#allocation5 + $0x64] sm:$0xf]  ;;  %v1293_v0 = vpack.c.bf16 %v100_v54, %v98_v53 }
  0x24   :  { %331 = vmatpush.bf16.msra.mxu0 %v874_v22  ;;  %1082 = vmatpush.bf16.msra.mxu2 %v874_v22  ;;  %v85_v59 = vld [vmem:[#allocation2 + $0x18] sm:$0xff]  ;;  %v891_v1 = vld [vmem:[#allocation5 + $0x68] sm:$0xf0]  ;;  %v1059_v2 = vld [vmem:[#allocation5 + $0xe4] sm:$0xf]  ;;  %v1295_v4 = vpack.c.bf16 %v101_v57, %v99_v55 }
  0x25   :  { %1090 = vmatpush.bf16.msra.mxu3 %v938_v23  ;;  %380 = vmatpush.bf16.msra.mxu1 %v938_v23  ;;  %v955_v3 = vld [vmem:[#allocation5 + $0xe8] sm:$0xf0]  ;;  %v1297_v5 = vpack.c.bf16 %v85_v59, %v83_v58  ;;  %v894_v6 = vor.u32 %v1043_v62, %v891_v1  ;;  %v1041_v8 = vld [vmem:[#allocation5 + $0x54] sm:$0xf]  ;;  %v883_v9 = vld [vmem:[#allocation5 + $0x58] sm:$0xf0] }
  0x26   :  { %v958_v7 = vor.u32 %v1059_v2, %v955_v3  ;;  %v1057_v10 = vld [vmem:[#allocation5 + $0xd4] sm:$0xf]  ;;  %v947_v11 = vld [vmem:[#allocation5 + $0xd8] sm:$0xf0]  ;;  %v886_v12 = vor.u32 %v1041_v8, %v883_v9  ;;  %v1039_v14 = vld [vmem:[#allocation5 + $0x44] sm:$0xf] }
  0x27   :  { %v950_v13 = vor.u32 %v1057_v10, %v947_v11  ;;  %v875_v15 = vld [vmem:[#allocation5 + $0x48] sm:$0xf0]  ;;  %v1055_v16 = vld [vmem:[#allocation5 + $0xc4] sm:$0xf]  ;;  %v88_v19 = vld [vmem:[#allocation2 + $0x30] sm:$0xff] }
  0x28   :  { %332 = vmatpush.bf16.msra.mxu0 %v866_v28  ;;  %1083 = vmatpush.bf16.msra.mxu2 %v866_v28  ;;  %v939_v17 = vld [vmem:[#allocation5 + $0xc8] sm:$0xf0]  ;;  %v86_v18 = vld [vmem:[#allocation2 + $0x20] sm:$0xff]  ;;  %v878_v20 = vor.u32 %v1039_v14, %v875_v15  ;;  %v1037_v22 = vld [vmem:[#allocation5 + $0x34] sm:$0xf] }
  0x29   :  { %1091 = vmatpush.bf16.msra.mxu3 %v930_v29  ;;  %381 = vmatpush.bf16.msra.mxu1 %v930_v29  ;;  %v942_v21 = vor.u32 %v1055_v16, %v939_v17  ;;  %v867_v23 = vld [vmem:[#allocation5 + $0x38] sm:$0xf0]  ;;  %v1053_v24 = vld [vmem:[#allocation5 + $0xb4] sm:$0xf]  ;;  %v102_v26 = vld [vmem:[#allocation2 + $0xa0] sm:$0xff] }
  0x2a   :  { %v931_v25 = vld [vmem:[#allocation5 + $0xb8] sm:$0xf0]  ;;  %v104_v27 = vld [vmem:[#allocation2 + $0xb0] sm:$0xff]  ;;  %v103_v28 = vld [vmem:[#allocation2 + $0xa8] sm:$0xff]  ;;  %v870_v32 = vor.u32 %v1037_v22, %v867_v23 }
  0x2b   :  { %v105_v29 = vld [vmem:[#allocation2 + $0xb8] sm:$0xff]  ;;  %v87_v30 = vld [vmem:[#allocation2 + $0x28] sm:$0xff]  ;;  %v934_v33 = vor.u32 %v1053_v24, %v931_v25  ;;  %v1305_v36 = vpack.c.bf16 %v104_v27, %v102_v26  ;;  %v1051_v38 = vld [vmem:[#allocation5 + $0xa4] sm:$0xf] }
  0x2c   :  { %333 = vmatpush.bf16.msra.mxu0 %v858_v34  ;;  %1084 = vmatpush.bf16.msra.mxu2 %v858_v34  ;;  %v89_v31 = vld [vmem:[#allocation2 + $0x38] sm:$0xff]  ;;  %v1035_v34 = vld [vmem:[#allocation5 + $0x24] sm:$0xf]  ;;  %v859_v37 = vld [vmem:[#allocation5 + $0x28] sm:$0xf0] }
  0x2d   :  { %1092 = vmatpush.bf16.msra.mxu3 %v922_v35  ;;  %382 = vmatpush.bf16.msra.mxu1 %v922_v35  ;;  %v1303_v35 = vpack.c.bf16 %v88_v19, %v86_v18  ;;  %v923_v39 = vld [vmem:[#allocation5 + $0xa8] sm:$0xf0]  ;;  %v1309_v41 = vpack.c.bf16 %v89_v31, %v87_v30  ;;  %v1033_v44 = vld [vmem:[#allocation5 + $0x14] sm:$0xf]  ;;  %v851_v45 = vld [vmem:[#allocation5 + $0x18] sm:$0xf0] }
  0x2e   :  { %v926_v43 = vor.u32 %v1051_v38, %v923_v39  ;;  %v1049_v46 = vld [vmem:[#allocation5 + $0x94] sm:$0xf]  ;;  %v915_v47 = vld [vmem:[#allocation5 + $0x98] sm:$0xf0]  ;;  %v854_v48 = vor.u32 %v1033_v44, %v851_v45  ;;  %v1031_v50 = vld [vmem:[#allocation5 + $0x4] sm:$0xf] }
  0x2f   :  { %v918_v49 = vor.u32 %v1049_v46, %v915_v47  ;;  %v843_v51 = vld [vmem:[#allocation5 + $0x8] sm:$0xf0]  ;;  %v92_v57 = vld [vmem:[#allocation2 + $0x50] sm:$0xff]  ;;  %v106_v58 = vld [vmem:[#allocation2 + $0xc0] sm:$0xff] }
  0x30   :  { %334 = vmatpush.bf16.msra.mxu0 %v850_v40  ;;  %1085 = vmatpush.bf16.msra.mxu2 %v850_v40  ;;  %v1307_v40 = vpack.c.bf16 %v105_v29, %v103_v28  ;;  %v907_v53 = vld [vmem:[#allocation5 + $0x88] sm:$0xf0]  ;;  %v846_v54 = vor.u32 %v1031_v50, %v843_v51  ;;  %v108_v59 = vld [vmem:[#allocation2 + $0xd0] sm:$0xff]  ;;  %v93_v1 = vld [vmem:[#allocation2 + $0x58] sm:$0xff] }
  0x31   :  { %1093 = vmatpush.bf16.msra.mxu3 %v914_v42  ;;  %383 = vmatpush.bf16.msra.mxu1 %v914_v42  ;;  %v862_v42 = vor.u32 %v1035_v34, %v859_v37  ;;  %v91_v62 = vld [vmem:[#allocation2 + $0x48] sm:$0xff]  ;;  %v1315_v3 = vpack.c.bf16 %v108_v59, %v106_v58  ;;  %v94_v8 = vld [vmem:[#allocation2 + $0x60] sm:$0xff]  ;;  %v96_v9 = vld [vmem:[#allocation2 + $0x70] sm:$0xff] }
  0x32   :  { %v110_v10 = vld [vmem:[#allocation2 + $0xe0] sm:$0xff]  ;;  %v112_v11 = vld [vmem:[#allocation2 + $0xf0] sm:$0xff]  ;;  %v95_v14 = vld [vmem:[#allocation2 + $0x68] sm:$0xff]  ;;  %v120_v16 = vpack.c.bf16 %v96_v9, %v94_v8 }
  0x33   :  { %v97_v15 = vld [vmem:[#allocation2 + $0x78] sm:$0xff]  ;;  %v1321_v17 = vpack.c.bf16 %v112_v11, %v110_v10  ;;  %v1068_v22 = vld [vmem:[#allocation8 + $0x28] sm:$0xff]  ;;  %v1067_v23 = vld [vmem:[#allocation8 + $0x20] sm:$0xff] }
  0x34   :  { %335 = vmatpush.bf16.msra.mxu0 %v842_v52  ;;  %1086 = vmatpush.bf16.msra.mxu2 %v842_v52  ;;  %v1047_v52 = vld [vmem:[#allocation5 + $0x84] sm:$0xf]  ;;  %v121_v19 = vpack.c.bf16 %v97_v15, %v95_v14  ;;  %v1066_v24 = vld [vmem:[#allocation8 + $0x18] sm:$0xff]  ;;  %v1065_v25 = vld [vmem:[#allocation8 + $0x10] sm:$0xff] }
  0x35   :  { %1094 = vmatpush.bf16.msra.mxu3 %v906_v56  ;;  %384 = vmatpush.bf16.msra.mxu1 %v906_v56  ;;  %v910_v55 = vor.u32 %v1047_v52, %v907_v53  ;;  %v90_v56 = vld [vmem:[#allocation2 + $0x40] sm:$0xff]  ;;  %v1076_v45 = vld [vmem:[#allocation8 + $0x68] sm:$0xff] }
  0x36   :  { %v118_v2 = vpack.c.bf16 %v92_v57, %v90_v56  ;;  %v1078_v26 = vld [vmem:[#allocation8 + $0x78] sm:$0xff] }
  0x37   :  { %336 = vmatmul.bf16.vlgmr.msra.gmra.mxu0 %v1291_v63  ;;  %356 = vmatmul.bf16.vlgmr.msra.gmra.mxu2 %v1293_v0  ;;  %v1331_v27 = vld [vmem:[#allocation7] sm:$0x3] }
  0x38   :  { %426 = vmatpush.bf16.msrb.mxu2 %v902_v60  ;;  %405 = vmatmul.bf16.vlgmr.msra.gmra.mxu3 %v1295_v4  ;;  %v107_v60 = vld [vmem:[#allocation2 + $0xc8] sm:$0xff]  ;;  %v1334_v29 = vperm.slane %v1331_v27, 0  ;;  %v1074_v9 = vld [vmem:[#allocation8 + $0x58] sm:$0xff] }
  0x39   :  { %475 = vmatpush.bf16.msrb.mxu3 %v966_v61  ;;  %385 = vmatmul.bf16.vlgmr.msra.gmra.mxu1 %v1297_v5  ;;  %v109_v61 = vld [vmem:[#allocation2 + $0xd8] sm:$0xff] }
  0x3a   :  { %753 = vmatpush.bf16.msrb.mxu1 %v1078_v26 }
  0x3c   :  { %427 = vmatpush.bf16.msrb.mxu2 %v894_v6  ;;  %v1317_v6 = vpack.c.bf16 %v109_v61, %v107_v60 }
  0x3d   :  { %476 = vmatpush.bf16.msrb.mxu3 %v958_v7  ;;  %v119_v7 = vpack.c.bf16 %v93_v1, %v91_v62 }
  0x40   :  { %428 = vmatpush.bf16.msrb.mxu2 %v886_v12  ;;  %v111_v12 = vld [vmem:[#allocation2 + $0xe8] sm:$0xff] }
  0x41   :  { %477 = vmatpush.bf16.msrb.mxu3 %v950_v13  ;;  %v113_v13 = vld [vmem:[#allocation2 + $0xf8] sm:$0xff] }
  0x42   :  { %v1323_v18 = vpack.c.bf16 %v113_v13, %v111_v12 }
  0x44   :  { %429 = vmatpush.bf16.msrb.mxu2 %v878_v20  ;;  %v1070_v20 = vld [vmem:[#allocation8 + $0x38] sm:$0xff] }
  0x45   :  { %478 = vmatpush.bf16.msrb.mxu3 %v942_v21  ;;  %704 = vmatpush.bf16.msrb.mxu0 %v1070_v20  ;;  %v1069_v21 = vld [vmem:[#allocation8 + $0x30] sm:$0xff] }
  0x47   :  { %341 = vmatmul.bf16.gmra.mxu0 %v1303_v35  ;;  %361 = vmatmul.bf16.gmra.mxu2 %v1305_v36 }
  0x48   :  { %430 = vmatpush.bf16.msrb.mxu2 %v870_v32  ;;  %410 = vmatmul.bf16.gmra.mxu3 %v1307_v40  ;;  %v1077_v32 = vld [vmem:[#allocation8 + $0x70] sm:$0xff] }
  0x49   :  { %479 = vmatpush.bf16.msrb.mxu3 %v934_v33  ;;  %390 = vmatmul.bf16.gmra.mxu1 %v1309_v41 }
  0x4a   :  { %705 = vmatpush.bf16.msrb.mxu0 %v1069_v21  ;;  %754 = vmatpush.bf16.msrb.mxu1 %v1077_v32  ;;  %v1073_v21 = vld [vmem:[#allocation8 + $0x50] sm:$0xff] }
  0x4c   :  { %431 = vmatpush.bf16.msrb.mxu2 %v862_v42 }
  0x4d   :  { %480 = vmatpush.bf16.msrb.mxu3 %v926_v43 }
  0x4e   :  { %706 = vmatpush.bf16.msrb.mxu0 %v1068_v22  ;;  %755 = vmatpush.bf16.msrb.mxu1 %v1076_v45  ;;  %v1071_v45 = vld [vmem:[#allocation8 + $0x40] sm:$0xff] }
  0x50   :  { %432 = vmatpush.bf16.msrb.mxu2 %v854_v48 }
  0x51   :  { %481 = vmatpush.bf16.msrb.mxu3 %v918_v49 }
  0x52   :  { %707 = vmatpush.bf16.msrb.mxu0 %v1067_v23 }
  0x54   :  { %433 = vmatpush.bf16.msrb.mxu2 %v846_v54 }
  0x55   :  { %482 = vmatpush.bf16.msrb.mxu3 %v910_v55  ;;  %v1075_v55 = vld [vmem:[#allocation8 + $0x60] sm:$0xff] }
  0x56   :  { %708 = vmatpush.bf16.msrb.mxu0 %v1066_v24  ;;  %756 = vmatpush.bf16.msrb.mxu1 %v1075_v55 }
  0x57   :  { %346 = vmatmul.bf16.gmra.mxu0 %v118_v2  ;;  %366 = vmatmul.bf16.gmra.mxu2 %v1315_v3 }
  0x58   :  { %415 = vmatmul.bf16.gmra.mxu3 %v1317_v6 }
  0x59   :  { %395 = vmatmul.bf16.gmra.mxu1 %v119_v7 }
  0x5a   :  { %709 = vmatpush.bf16.msrb.mxu0 %v1065_v25  ;;  %757 = vmatpush.bf16.msrb.mxu1 %v1074_v9 }
  0x5e   :  { %758 = vmatpush.bf16.msrb.mxu1 %v1073_v21 }
  0x67   :  { %351 = vmatmul.bf16.gmra.mxu0 %v120_v16  ;;  %371 = vmatmul.bf16.gmra.mxu2 %v1321_v17 }
  0x68   :  { %420 = vmatmul.bf16.gmra.mxu3 %v1323_v18 }
  0x69   :  { %400 = vmatmul.bf16.gmra.mxu1 %v121_v19 }
  0x77   :  { %434 = vmatmul.bf16.vlgmr.msrb.gmra.mxu2 %v1291_v63  ;;  %v1064_v63 = vld [vmem:[#allocation8 + $0x8] sm:$0xff] }
  0x78   :  { %483 = vmatmul.bf16.vlgmr.msrb.gmra.mxu3 %v1297_v5  ;;  %710 = vmatpush.bf16.msrb.mxu0 %v1064_v63  ;;  %v1063_v5 = vld [vmem:[#allocation8] sm:$0xff] }
  0x7c   :  { %711 = vmatpush.bf16.msrb.mxu0 %v1063_v5 }
  0x87   :  { %439 = vmatmul.bf16.gmra.mxu2 %v1303_v35 }
  0x88   :  { %488 = vmatmul.bf16.gmra.mxu3 %v1309_v41 }
  0x97   :  { %444 = vmatmul.bf16.gmra.mxu2 %v118_v2 }
  0x98   :  { %493 = vmatmul.bf16.gmra.mxu3 %v119_v7 }
  0xa7   :  { %449 = vmatmul.bf16.gmra.mxu2 %v120_v16 }
  0xa8   :  { %498 = vmatmul.bf16.gmra.mxu3 %v121_v19 }
  0xb4   :  { %v337_v28 = vpop.f32.mrf.mxu0 }
  0xb5   :  { %v338_v31 = vadd.f32 %v337_v28, %v1334_v29 }
  0xb6   :  { %v386_v30 = vpop.f32.mrf.mxu1 }
  0xb7   :  { %454 = vmatmul.bf16.gmra.mxu2 %v1293_v0  ;;  %v387_v34 = vadd.f32 %v386_v30, %v338_v31 }
  0xb8   :  { %503 = vmatmul.bf16.gmra.mxu3 %v1295_v4 }
  0xb9   :  { %v524_v43 = vmax.f32 %v387_v34, 0.0 }
  0xba   :  { %v357_v33 = vpop.f32.mrf.mxu2 }
  0xbb   :  { %v358_v35 = vadd.f32 %v357_v33, %v1334_v29  ;;  %v406_v37 = vpop.f32.mrf.mxu3  ;;  %v1072_v33 = vld [vmem:[#allocation8 + $0x48] sm:$0xff] }
  0xbc   :  { %v339_v38 = vpop.f32.mrf.mxu0  ;;  %759 = vmatpush.bf16.msrb.mxu1 %v1072_v33 }
  0xbd   :  { %v407_v39 = vadd.f32 %v406_v37, %v358_v35  ;;  %v340_v41 = vadd.f32 %v339_v38, %v1334_v29 }
  0xbe   :  { %v388_v42 = vpop.f32.mrf.mxu1 }
  0xbf   :  { %v389_v44 = vadd.f32 %v388_v42, %v340_v41  ;;  %v540_v52 = vmax.f32 %v407_v39, 0.0 }
  0xc0   :  { %760 = vmatpush.bf16.msrb.mxu1 %v1071_v45 }
  0xc1   :  { %v526_v46 = vmax.f32 %v389_v44, 0.0 }
  0xc2   :  { %v359_v0 = vpop.f32.mrf.mxu2 }
  0xc3   :  { %v556_v47 = vpack.c.bf16 %v526_v46, %v524_v43  ;;  %v360_v4 = vadd.f32 %v359_v0, %v1334_v29  ;;  %v408_v48 = vpop.f32.mrf.mxu3 }
  0xc4   :  { %v342_v49 = vpop.f32.mrf.mxu0 }
  0xc5   :  { %v409_v50 = vadd.f32 %v408_v48, %v360_v4  ;;  %712 = vmatmul.bf16.vlgmr.msrb.gmra.mxu0 %v556_v47  ;;  %v343_v54 = vadd.f32 %v342_v49, %v1334_v29 }
  0xc6   :  { %v391_v51 = vpop.f32.mrf.mxu1 }
  0xc7   :  { %v542_v53 = vmax.f32 %v409_v50, 0.0  ;;  %459 = vmatmul.bf16.gmra.mxu2 %v1305_v36  ;;  %v392_v58 = vadd.f32 %v391_v51, %v343_v54 }
  0xc8   :  { %508 = vmatmul.bf16.gmra.mxu3 %v1307_v40 }
  0xc9   :  { %v1345_v56 = vpack.c.bf16 %v542_v53, %v540_v52  ;;  %v528_v7 = vmax.f32 %v392_v58, 0.0 }
  0xca   :  { %v362_v57 = vpop.f32.mrf.mxu2 }
  0xcb   :  { %v363_v59 = vadd.f32 %v362_v57, %v1334_v29  ;;  %v411_v60 = vpop.f32.mrf.mxu3 }
  0xcc   :  { %v344_v61 = vpop.f32.mrf.mxu0 }
  0xcd   :  { %v412_v62 = vadd.f32 %v411_v60, %v363_v59  ;;  %v345_v1 = vadd.f32 %v344_v61, %v1334_v29 }
  0xce   :  { %v393_v2 = vpop.f32.mrf.mxu1 }
  0xcf   :  { %v394_v8 = vadd.f32 %v393_v2, %v345_v1  ;;  %v544_v16 = vmax.f32 %v412_v62, 0.0  ;;  %v1365_v2 = vperm.slane %v1331_v27, 1 }
  0xd1   :  { %v530_v36 = vmax.f32 %v394_v8, 0.0 }
  0xd2   :  { %v364_v10 = vpop.f32.mrf.mxu2 }
  0xd3   :  { %v365_v40 = vadd.f32 %v364_v10, %v1334_v29  ;;  %v413_v11 = vpop.f32.mrf.mxu3  ;;  %v558_v12 = vpack.c.bf16 %v530_v36, %v528_v7 }
  0xd4   :  { %v347_v13 = vpop.f32.mrf.mxu0 }
  0xd5   :  { %v414_v14 = vadd.f32 %v413_v11, %v365_v40  ;;  %717 = vmatmul.bf16.gmra.mxu0 %v558_v12  ;;  %v348_v20 = vadd.f32 %v347_v13, %v1334_v29 }
  0xd6   :  { %v396_v15 = vpop.f32.mrf.mxu1 }
  0xd7   :  { %v546_v19 = vmax.f32 %v414_v14, 0.0  ;;  %464 = vmatmul.bf16.gmra.mxu2 %v1315_v3  ;;  %v397_v24 = vadd.f32 %v396_v15, %v348_v20 }
  0xd8   :  { %513 = vmatmul.bf16.gmra.mxu3 %v1317_v6 }
  0xd9   :  { %v1353_v22 = vpack.c.bf16 %v546_v19, %v544_v16  ;;  %v532_v31 = vmax.f32 %v397_v24, 0.0 }
  0xda   :  { %v367_v23 = vpop.f32.mrf.mxu2 }
  0xdb   :  { %v368_v25 = vadd.f32 %v367_v23, %v1334_v29  ;;  %v416_v63 = vpop.f32.mrf.mxu3 }
  0xdc   :  { %v349_v5 = vpop.f32.mrf.mxu0 }
  0xdd   :  { %v417_v26 = vadd.f32 %v416_v63, %v368_v25  ;;  %v350_v28 = vadd.f32 %v349_v5, %v1334_v29 }
  0xde   :  { %v398_v30 = vpop.f32.mrf.mxu1 }
  0xdf   :  { %v399_v32 = vadd.f32 %v398_v30, %v350_v28  ;;  %v548_v42 = vmax.f32 %v417_v26, 0.0 }
  0xe1   :  { %v534_v3 = vmax.f32 %v399_v32, 0.0 }
  0xe2   :  { %v369_v34 = vpop.f32.mrf.mxu2 }
  0xe3   :  { %v370_v6 = vadd.f32 %v369_v34, %v1334_v29  ;;  %v418_v35 = vpop.f32.mrf.mxu3  ;;  %v560_v37 = vpack.c.bf16 %v534_v3, %v532_v31 }
  0xe4   :  { %v352_v38 = vpop.f32.mrf.mxu0 }
  0xe5   :  { %v419_v39 = vadd.f32 %v418_v35, %v370_v6  ;;  %722 = vmatmul.bf16.gmra.mxu0 %v560_v37  ;;  %v353_v44 = vadd.f32 %v352_v38, %v1334_v29 }
  0xe6   :  { %v401_v41 = vpop.f32.mrf.mxu1 }
  0xe7   :  { %v550_v43 = vmax.f32 %v419_v39, 0.0  ;;  %469 = vmatmul.bf16.gmra.mxu2 %v1321_v17  ;;  %v402_v47 = vadd.f32 %v401_v41, %v353_v44 }
  0xe8   :  { %518 = vmatmul.bf16.gmra.mxu3 %v1323_v18 }
  0xe9   :  { %v568_v46 = vpack.c.bf16 %v550_v43, %v548_v42  ;;  %v536_v53 = vmax.f32 %v402_v47, 0.0 }
  0xea   :  { %v372_v0 = vpop.f32.mrf.mxu2 }
  0xeb   :  { %v373_v4 = vadd.f32 %v372_v0, %v1334_v29  ;;  %v421_v48 = vpop.f32.mrf.mxu3 }
  0xec   :  { %v354_v49 = vpop.f32.mrf.mxu0 }
  0xed   :  { %v422_v50 = vadd.f32 %v421_v48, %v373_v4  ;;  %v355_v51 = vadd.f32 %v354_v49, %v1334_v29 }
  0xee   :  { %v403_v52 = vpop.f32.mrf.mxu1 }
  0xef   :  { %v404_v54 = vadd.f32 %v403_v52, %v355_v51  ;;  %v552_v60 = vmax.f32 %v422_v50, 0.0 }
  0xf1   :  { %v538_v55 = vmax.f32 %v404_v54, 0.0 }
  0xf2   :  { %v374_v57 = vpop.f32.mrf.mxu2 }
  0xf3   :  { %v375_v17 = vadd.f32 %v374_v57, %v1334_v29  ;;  %v423_v58 = vpop.f32.mrf.mxu3  ;;  %v562_v18 = vpack.c.bf16 %v538_v55, %v536_v53 }
  0xf5   :  { %v424_v59 = vadd.f32 %v423_v58, %v375_v17  ;;  %727 = vmatmul.bf16.gmra.mxu0 %v562_v18 }
  0xf7   :  { %v554_v61 = vmax.f32 %v424_v59, 0.0 }
  0xf9   :  { %v570_v62 = vpack.c.bf16 %v554_v61, %v552_v60 }
  0xfa   :  { %v435_v1 = vpop.f32.mrf.mxu2 }
  0xfb   :  { %v484_v7 = vpop.f32.mrf.mxu3  ;;  %v436_v8 = vadd.f32 %v435_v1, %v1365_v2 }
  0xfd   :  { %v485_v36 = vadd.f32 %v484_v7, %v436_v8 }
  0xff   :  { %v525_v11 = vmax.f32 %v485_v36, 0.0 }
 0x102   :  { %v437_v9 = vpop.f32.mrf.mxu2 }
 0x103   :  { %v438_v10 = vadd.f32 %v437_v9, %v1365_v2  ;;  %v486_v40 = vpop.f32.mrf.mxu3 }
 0x105   :  { %v487_v29 = vadd.f32 %v486_v40, %v438_v10  ;;  %732 = vmatmul.bf16.gmra.mxu0 %v1345_v56 }
 0x107   :  { %v527_v12 = vmax.f32 %v487_v29, 0.0 }
 0x109   :  { %v557_v13 = vpack.c.bf16 %v527_v12, %v525_v11 }
 0x10a   :  { %v440_v14 = vpop.f32.mrf.mxu2 }
 0x10b   :  { %v489_v15 = vpop.f32.mrf.mxu3  ;;  %761 = vmatmul.bf16.vlgmr.msrb.gmra.mxu1 %v557_v13  ;;  %v441_v27 = vadd.f32 %v440_v14, %v1365_v2 }
 0x10d   :  { %v490_v19 = vadd.f32 %v489_v15, %v441_v27 }
 0x10f   :  { %v529_v24 = vmax.f32 %v490_v19, 0.0 }
 0x112   :  { %v442_v16 = vpop.f32.mrf.mxu2 }
 0x113   :  { %v443_v20 = vadd.f32 %v442_v16, %v1365_v2  ;;  %v491_v21 = vpop.f32.mrf.mxu3 }
 0x115   :  { %v492_v23 = vadd.f32 %v491_v21, %v443_v20  ;;  %737 = vmatmul.bf16.gmra.mxu0 %v1353_v22 }
 0x117   :  { %v531_v25 = vmax.f32 %v492_v23, 0.0 }
 0x119   :  { %v559_v63 = vpack.c.bf16 %v531_v25, %v529_v24 }
 0x11a   :  { %v445_v56 = vpop.f32.mrf.mxu2 }
 0x11b   :  { %v494_v5 = vpop.f32.mrf.mxu3  ;;  %766 = vmatmul.bf16.gmra.mxu1 %v559_v63  ;;  %v446_v26 = vadd.f32 %v445_v56, %v1365_v2 }
 0x11d   :  { %v495_v30 = vadd.f32 %v494_v5, %v446_v26 }
 0x11f   :  { %v533_v3 = vmax.f32 %v495_v30, 0.0 }
 0x122   :  { %v447_v28 = vpop.f32.mrf.mxu2 }
 0x123   :  { %v448_v31 = vadd.f32 %v447_v28, %v1365_v2  ;;  %v496_v32 = vpop.f32.mrf.mxu3 }
 0x125   :  { %v497_v33 = vadd.f32 %v496_v32, %v448_v31  ;;  %742 = vmatmul.bf16.gmra.mxu0 %v568_v46  ;;  %v1388_v32 = vld [vmem:[%s1416_s4] ss:$0 sm:$0xff]  ;;  %s1245_s4 = smov [#allocation10]  }
 0x126   :  { %s822_s17 = sshll.u32 %s1245_s4, 4  ;;  %s823_s17 = int_to_ptr.vmem [resolvable:$true] %s822_s17 }
 0x127   :  { %v535_v34 = vmax.f32 %v497_v33, 0.0 }
 0x129   :  { %v561_v6 = vpack.c.bf16 %v535_v34, %v533_v3 }
 0x12a   :  { %v450_v35 = vpop.f32.mrf.mxu2 }
 0x12b   :  { %v499_v22 = vpop.f32.mrf.mxu3  ;;  %771 = vmatmul.bf16.gmra.mxu1 %v561_v6  ;;  %v451_v37 = vadd.f32 %v450_v35, %v1365_v2 }
 0x12d   :  { %v500_v39 = vadd.f32 %v499_v22, %v451_v37 }
 0x12f   :  { %v537_v44 = vmax.f32 %v500_v39, 0.0 }
 0x132   :  { %v452_v38 = vpop.f32.mrf.mxu2 }
 0x133   :  { %v453_v41 = vadd.f32 %v452_v38, %v1365_v2  ;;  %v501_v42 = vpop.f32.mrf.mxu3 }
 0x135   :  { %v502_v43 = vadd.f32 %v501_v42, %v453_v41  ;;  %747 = vmatmul.bf16.gmra.mxu0 %v570_v62 }
 0x137   :  { %v539_v45 = vmax.f32 %v502_v43, 0.0 }
 0x139   :  { %v563_v0 = vpack.c.bf16 %v539_v45, %v537_v44 }
 0x13a   :  { %v455_v47 = vpop.f32.mrf.mxu2 }
 0x13b   :  { %v504_v46 = vpop.f32.mrf.mxu3  ;;  %776 = vmatmul.bf16.gmra.mxu1 %v563_v0  ;;  %v456_v4 = vadd.f32 %v455_v47, %v1365_v2 }
 0x13d   :  { %v505_v49 = vadd.f32 %v504_v46, %v456_v4 }
 0x13f   :  { %v541_v53 = vmax.f32 %v505_v49, 0.0 }
 0x142   :  { %v457_v48 = vpop.f32.mrf.mxu2  ;;  %v713_v14 = vpop.f32.mrf.mxu0 }
 0x143   :  { %v458_v50 = vadd.f32 %v457_v48, %v1365_v2  ;;  %v506_v51 = vpop.f32.mrf.mxu3  ;;  %v714_v3 = vadd.f32 %v1388_v32, %v713_v14 }
 0x145   :  { %v507_v52 = vadd.f32 %v506_v51, %v458_v50 }
 0x147   :  { %v543_v54 = vmax.f32 %v507_v52, 0.0 }
 0x149   :  { %v565_v55 = vpack.c.bf16 %v543_v54, %v541_v53 }
 0x14a   :  { %v460_v57 = vpop.f32.mrf.mxu2  ;;  %v715_v23 = vpop.f32.mrf.mxu0 }
 0x14b   :  { %v509_v17 = vpop.f32.mrf.mxu3  ;;  %781 = vmatmul.bf16.gmra.mxu1 %v565_v55  ;;  %v461_v58 = vadd.f32 %v460_v57, %v1365_v2 }
 0x14d   :  { %v510_v59 = vadd.f32 %v509_v17, %v461_v58 }
 0x14f   :  { %v545_v1 = vmax.f32 %v510_v59, 0.0 }
 0x152   :  { %v462_v18 = vpop.f32.mrf.mxu2  ;;  %v718_v31 = vpop.f32.mrf.mxu0 }
 0x153   :  { %v463_v60 = vadd.f32 %v462_v18, %v1365_v2  ;;  %v511_v61 = vpop.f32.mrf.mxu3  ;;  %v719_v38 = vadd.f32 %v1388_v32, %v718_v31 }
 0x155   :  { %v512_v62 = vadd.f32 %v511_v61, %v463_v60 }
 0x157   :  { %v547_v7 = vmax.f32 %v512_v62, 0.0 }
 0x159   :  { %v567_v8 = vpack.c.bf16 %v547_v7, %v545_v1 }
 0x15a   :  { %v465_v9 = vpop.f32.mrf.mxu2  ;;  %v720_v33 = vpop.f32.mrf.mxu0 }
 0x15b   :  { %v514_v36 = vpop.f32.mrf.mxu3  ;;  %786 = vmatmul.bf16.gmra.mxu1 %v567_v8  ;;  %v466_v10 = vadd.f32 %v465_v9, %v1365_v2  ;;  %v721_v43 = vadd.f32 %v1388_v32, %v720_v33 }
 0x15d   :  { %v515_v29 = vadd.f32 %v514_v36, %v466_v10 }
 0x15f   :  { %v549_v15 = vmax.f32 %v515_v29, 0.0 }
 0x162   :  { %v467_v40 = vpop.f32.mrf.mxu2  ;;  %v723_v35 = vpop.f32.mrf.mxu0 }
 0x163   :  { %v468_v11 = vadd.f32 %v467_v40, %v1365_v2  ;;  %v516_v12 = vpop.f32.mrf.mxu3  ;;  %v724_v47 = vadd.f32 %v1388_v32, %v723_v35 }
 0x165   :  { %v517_v13 = vadd.f32 %v516_v12, %v468_v11 }
 0x167   :  { %v551_v27 = vmax.f32 %v517_v13, 0.0 }
 0x169   :  { %v569_v16 = vpack.c.bf16 %v551_v27, %v549_v15 }
 0x16a   :  { %v470_v19 = vpop.f32.mrf.mxu2  ;;  %v725_v39 = vpop.f32.mrf.mxu0 }
 0x16b   :  { %v519_v20 = vpop.f32.mrf.mxu3  ;;  %791 = vmatmul.bf16.gmra.mxu1 %v569_v16  ;;  %v471_v21 = vadd.f32 %v470_v19, %v1365_v2  ;;  %v726_v49 = vadd.f32 %v1388_v32, %v725_v39 }
 0x16d   :  { %v520_v25 = vadd.f32 %v519_v20, %v471_v21 }
 0x16f   :  { %v553_v26 = vmax.f32 %v520_v25, 0.0 }
 0x172   :  { %v472_v24 = vpop.f32.mrf.mxu2  ;;  %v728_v0 = vpop.f32.mrf.mxu0 }
 0x173   :  { %v473_v63 = vadd.f32 %v472_v24, %v1365_v2  ;;  %v521_v56 = vpop.f32.mrf.mxu3  ;;  %v716_v2 = vadd.f32 %v1388_v32, %v715_v23  ;;  %v729_v53 = vadd.f32 %v1388_v32, %v728_v0 }
 0x175   :  { %v522_v5 = vadd.f32 %v521_v56, %v473_v63 }
 0x177   :  { %v555_v28 = vmax.f32 %v522_v5, 0.0 }
 0x179   :  { %v571_v30 = vpack.c.bf16 %v555_v28, %v553_v26 }
 0x17a   :  { %v730_v48 = vpop.f32.mrf.mxu0 }
 0x17b   :  { %796 = vmatmul.bf16.gmra.mxu1 %v571_v30  ;;  %v731_v57 = vadd.f32 %v1388_v32, %v730_v48 }
 0x182   :  { %v733_v52 = vpop.f32.mrf.mxu0 }
 0x183   :  { %v734_v59 = vadd.f32 %v1388_v32, %v733_v52 }
 0x188   :  { %v762_v34 = vpop.f32.mrf.mxu1 }
 0x189   :  { %v763_v6 = vadd.f32 %v762_v34, %v714_v3 }
 0x18a   :  { %v735_v17 = vpop.f32.mrf.mxu0 }
 0x18b   :  { %802 = vst [vmem:[#allocation10] sm:$0xff] %v763_v6  ;;  %v736_v1 = vadd.f32 %v1388_v32, %v735_v17 }
 0x190   :  { %v764_v22 = vpop.f32.mrf.mxu1 }
 0x191   :  { %v765_v37 = vadd.f32 %v764_v22, %v716_v2 }
 0x192   :  { %v738_v62 = vpop.f32.mrf.mxu0 }
 0x193   :  { %803 = vst [vmem:[#allocation10 + $0x8] sm:$0xff] %v765_v37  ;;  %v739_v36 = vadd.f32 %v1388_v32, %v738_v62 }
 0x198   :  { %v767_v41 = vpop.f32.mrf.mxu1 }
 0x199   :  { %v768_v42 = vadd.f32 %v767_v41, %v719_v38 }
 0x19a   :  { %v740_v9 = vpop.f32.mrf.mxu0 }
 0x19b   :  { %804 = vst [vmem:[#allocation10 + $0x10] sm:$0xff] %v768_v42  ;;  %v741_v11 = vadd.f32 %v1388_v32, %v740_v9 }
 0x1a0   :  { %v769_v44 = vpop.f32.mrf.mxu1 }
 0x1a1   :  { %v770_v45 = vadd.f32 %v769_v44, %v721_v43 }
 0x1a2   :  { %v743_v29 = vpop.f32.mrf.mxu0 }
 0x1a3   :  { %805 = vst [vmem:[#allocation10 + $0x18] sm:$0xff] %v770_v45  ;;  %v744_v14 = vadd.f32 %v1388_v32, %v743_v29 }
 0x1a8   :  { %v772_v46 = vpop.f32.mrf.mxu1 }
 0x1a9   :  { %v773_v4 = vadd.f32 %v772_v46, %v724_v47 }
 0x1aa   :  { %v745_v15 = vpop.f32.mrf.mxu0 }
 0x1ab   :  { %806 = vst [vmem:[#allocation10 + $0x20] sm:$0xff] %v773_v4  ;;  %v746_v19 = vadd.f32 %v1388_v32, %v745_v15 }
 0x1b0   :  { %v774_v50 = vpop.f32.mrf.mxu1 }
 0x1b1   :  { %v775_v51 = vadd.f32 %v774_v50, %v726_v49 }
 0x1b2   :  { %v748_v23 = vpop.f32.mrf.mxu0 }
 0x1b3   :  { %807 = vst [vmem:[#allocation10 + $0x28] sm:$0xff] %v775_v51  ;;  %v749_v24 = vadd.f32 %v1388_v32, %v748_v23 }
 0x1b8   :  { %v777_v54 = vpop.f32.mrf.mxu1 }
 0x1b9   :  { %v778_v55 = vadd.f32 %v777_v54, %v729_v53 }
 0x1ba   :  { %v750_v56 = vpop.f32.mrf.mxu0 }
 0x1bb   :  { %808 = vst [vmem:[#allocation10 + $0x30] sm:$0xff] %v778_v55  ;;  %v751_v5 = vadd.f32 %v1388_v32, %v750_v56 }
 0x1c0   :  { %v779_v58 = vpop.f32.mrf.mxu1 }
 0x1c1   :  { %v780_v18 = vadd.f32 %v779_v58, %v731_v57 }
 0x1c3   :  { %809 = vst [vmem:[#allocation10 + $0x38] sm:$0xff] %v780_v18 }
 0x1c8   :  { %v782_v60 = vpop.f32.mrf.mxu1 }
 0x1c9   :  { %v783_v61 = vadd.f32 %v782_v60, %v734_v59 }
 0x1cb   :  { %810 = vst [vmem:[#allocation10 + $0x40] sm:$0xff] %v783_v61 }
 0x1d0   :  { %v784_v7 = vpop.f32.mrf.mxu1 }
 0x1d1   :  { %v785_v8 = vadd.f32 %v784_v7, %v736_v1 }
 0x1d3   :  { %811 = vst [vmem:[#allocation10 + $0x48] sm:$0xff] %v785_v8 }
 0x1d8   :  { %v787_v10 = vpop.f32.mrf.mxu1 }
 0x1d9   :  { %v788_v40 = vadd.f32 %v787_v10, %v739_v36 }
 0x1db   :  { %812 = vst [vmem:[#allocation10 + $0x50] sm:$0xff] %v788_v40 }
 0x1e0   :  { %v789_v12 = vpop.f32.mrf.mxu1 }
 0x1e1   :  { %v790_v13 = vadd.f32 %v789_v12, %v741_v11 }
 0x1e3   :  { %813 = vst [vmem:[#allocation10 + $0x58] sm:$0xff] %v790_v13 }
 0x1e8   :  { %v792_v27 = vpop.f32.mrf.mxu1 }
 0x1e9   :  { %v793_v16 = vadd.f32 %v792_v27, %v744_v14 }
 0x1eb   :  { %814 = vst [vmem:[#allocation10 + $0x60] sm:$0xff] %v793_v16 }
 0x1f0   :  { %v794_v20 = vpop.f32.mrf.mxu1 }
 0x1f1   :  { %v795_v21 = vadd.f32 %v794_v20, %v746_v19 }
 0x1f3   :  { %815 = vst [vmem:[#allocation10 + $0x68] sm:$0xff] %v795_v21 }
 0x1f8   :  { %v797_v25 = vpop.f32.mrf.mxu1 }
 0x1f9   :  { %v798_v63 = vadd.f32 %v797_v25, %v749_v24 }
 0x1fb   :  { %816 = vst [vmem:[#allocation10 + $0x70] sm:$0xff] %v798_v63 }
 0x200   :  { %v799_v26 = vpop.f32.mrf.mxu1 }
 0x201   :  { %v800_v28 = vadd.f32 %v799_v26, %v751_v5 }
 0x203   :  { %817 = vst [vmem:[#allocation10 + $0x78] sm:$0xff] %v800_v28 }
 0x204   :  { %830 = dma.vmem_to_hbm [thread:$0]  %s823_s17, 2048, %s825_s20, [#allocation4], %s1236_s26, %s1236_s26, %s1237_s27  }
 0x205   :  { %1233 = dma.done.wait [#allocation4], 2048  }
 0x206   :  { %1234 = vsyncadd [#allocation4], 4294965248 }
 0x207   :  { %835 = vsyncpa [#allocation3], 1 }
 0x208   :  { %836 = vsyncpa [#allocation6], 1 }
 0x209   :  { %837 = vsyncpa [#allocation9], 1 }
 0x20a   :  { %838 = vsyncpa [#allocation4], 1 }

</bundles_post_ra>
